<compile_context>
chip_gen: v5e
topology: v5e:2x2
jax: 0.10.0
libtpu: 0.0.40
codegen_flags: <defaults>
</compile_context>

<pallas_src>
import jax
import jax.numpy as jnp
from jax.experimental import pallas as pl
from jax.experimental.pallas import tpu as pltpu


def _round_up(x, m):
    return (x + m - 1) // m * m


def siamese_fc_kernel(x1_ref, x2_ref, wt_ref, b_ref, o_ref):
    # Hot path: two MXU matmuls (== concat + Linear) with f32 accumulation,
    # then f32 bias add.  wt_ref is the packed (2F, OUT) transposed weight.
    F = x1_ref.shape[1]
    acc = jnp.dot(x1_ref[...], wt_ref[:F, :], preferred_element_type=jnp.float32)
    acc = acc + jnp.dot(x2_ref[...], wt_ref[F:, :],
                        preferred_element_type=jnp.float32)
    o_ref[...] = (acc + b_ref[...]).astype(o_ref.dtype)


def siamese_forward(x1, x2, weight, bias, *, tile_b=512,
                    compute_dtype=jnp.bfloat16):
    """x1, x2: (B, F); weight: (OUT, 2F) PyTorch layout; bias: (OUT,)."""
    B, F = x1.shape
    OUT = weight.shape[0]

    # Batch tile: multiple of 8 (sublane), capped at the (8-rounded) batch.
    tb = max(8, _round_up(min(tile_b, _round_up(B, 8)), 8))
    Bp = _round_up(B, tb)

    cd = compute_dtype
    x1c = x1.astype(cd)
    x2c = x2.astype(cd)
    if Bp != B:
        pad = ((0, Bp - B), (0, 0))
        x1c = jnp.pad(x1c, pad)
        x2c = jnp.pad(x2c, pad)

    wt = weight.T.astype(cd)                       # (2F, OUT) packed RHS
    b2d = bias.reshape(1, OUT).astype(jnp.float32)  # broadcast over batch in-kernel

    grid = (Bp // tb,)

    out = pl.pallas_call(
        siamese_fc_kernel,
        out_shape=jax.ShapeDtypeStruct((Bp, OUT), x1.dtype),
        grid_spec=pltpu.PrefetchScalarGridSpec(
            num_scalar_prefetch=0,
            grid=grid,
            in_specs=[
                pl.BlockSpec((tb, F), lambda i: (i, 0)),        # x1 tile (pipelined)
                pl.BlockSpec((tb, F), lambda i: (i, 0)),        # x2 tile (pipelined)
                pl.BlockSpec((2 * F, OUT), lambda i: (0, 0)),   # weights, resident
                pl.BlockSpec((1, OUT), lambda i: (0, 0)),       # bias, resident
            ],
            out_specs=pl.BlockSpec((tb, OUT), lambda i: (i, 0)),
        ),
        compiler_params=pltpu.CompilerParams(
            dimension_semantics=("parallel",),
            vmem_limit_bytes=32 * 1024 * 1024,
        ),
    )(x1c, x2c, wt, b2d)

    return out[:B] if Bp != B else out


if __name__ == "__main__":
    # Small, deterministic shapes consistent with the module:
    # num_ftrs_resnet -> F (shrunk from 2048 for a small synthetic test),
    # fc: Linear(2*F, 2).
    B, F, OUT = 8, 256, 2

    key = jax.random.PRNGKey(0)
    k1, k2, kw, kb = jax.random.split(key, 4)

    x1 = jax.random.normal(k1, (B, F), dtype=jnp.float32)
    x2 = jax.random.normal(k2, (B, F), dtype=jnp.float32)

    # Deterministic parameter init mimicking nn.Linear defaults:
    # U(-1/sqrt(fan_in), 1/sqrt(fan_in)) with fan_in = 2*F.
    bound = 1.0 / jnp.sqrt(jnp.float32(2 * F))
    weight = jax.random.uniform(kw, (OUT, 2 * F), dtype=jnp.float32,
                                minval=-bound, maxval=bound)
    bias = jax.random.uniform(kb, (OUT,), dtype=jnp.float32,
                              minval=-bound, maxval=bound)

    # Pure-JAX reference (concat + affine).
    ref = jnp.concatenate([x1, x2], axis=1) @ weight.T + bias

    # f32 path: exact semantics of the PyTorch module.
    out_f32 = jax.block_until_ready(
        siamese_forward(x1, x2, weight, bias, compute_dtype=jnp.float32))
    assert out_f32.shape == (B, OUT)
    assert jnp.allclose(out_f32, ref, atol=1e-4, rtol=1e-4)

    # Default bf16-streaming path (halves HBM bytes on the hot operands).
    out_bf16 = jax.block_until_ready(siamese_forward(x1, x2, weight, bias))
    assert out_bf16.shape == (B, OUT)
    assert jnp.allclose(out_bf16, ref, atol=5e-2, rtol=5e-2)

    # Exercise the batch grid + padding path (several tiles, B not a tile multiple).
    B2 = 200
    xk1, xk2 = jax.random.split(jax.random.PRNGKey(1))
    y1 = jax.random.normal(xk1, (B2, F), dtype=jnp.float32)
    y2 = jax.random.normal(xk2, (B2, F), dtype=jnp.float32)
    ref2 = jnp.concatenate([y1, y2], axis=1) @ weight.T + bias
    out2 = jax.block_until_ready(
        siamese_forward(y1, y2, weight, bias, tile_b=64,
                        compute_dtype=jnp.float32))
    assert out2.shape == (B2, OUT)
    assert jnp.allclose(out2, ref2, atol=1e-4, rtol=1e-4)

    print("KERNEL_OK")
</pallas_src>

<mosaic_0001>
module attributes {stable_mosaic.version = 11 : i64} {
  func.func @siamese_fc_kernel(%arg0: i32, %arg1: memref<8x256xf32, #tpu.memory_space<vmem>>, %arg2: memref<8x256xf32, #tpu.memory_space<vmem>>, %arg3: memref<512x2xf32, #tpu.memory_space<vmem>>, %arg4: memref<1x2xf32, #tpu.memory_space<vmem>>, %arg5: memref<8x2xf32, #tpu.memory_space<vmem>>) attributes {dimension_semantics = [#tpu.dimension_semantics<parallel>], iteration_bounds = array<i64: 1>, scalar_prefetch = 0 : i64, scratch_operands = 0 : i64, tpu.core_type = #tpu.core_type<tc>, window_params = [{transform_indices = @transform_0, window_bounds = array<i64: 8, 256>}, {transform_indices = @transform_1, window_bounds = array<i64: 8, 256>}, {pipeline_mode = #tpu.pipeline_mode<synchronous>, transform_indices = @transform_2, window_bounds = array<i64: 512, 2>}, {pipeline_mode = #tpu.pipeline_mode<synchronous>, transform_indices = @transform_3, window_bounds = array<i64: 1, 2>}, {transform_indices = @transform_4, window_bounds = array<i64: 8, 2>}]} {
    %c0 = arith.constant 0 : index
    %c0_0 = arith.constant 0 : index
    %0 = vector.load %arg1[%c0, %c0_0] : memref<8x256xf32, #tpu.memory_space<vmem>>, vector<8x256xf32>
    %c0_1 = arith.constant 0 : index
    %c0_2 = arith.constant 0 : index
    %1 = vector.load %arg3[%c0_1, %c0_2] : memref<512x2xf32, #tpu.memory_space<vmem>>, vector<256x2xf32>
    %cst = arith.constant dense<0.000000e+00> : vector<8x2xf32>
    %2 = tpu.matmul %0, %1, %cst {dimension_numbers = #tpu.dot_dimension_numbers<[1], [0], [0], [1], [0, 0, 1, 1], [], []>} : vector<8x256xf32>, vector<256x2xf32>, vector<8x2xf32> -> vector<8x2xf32>
    %c0_3 = arith.constant 0 : index
    %c0_4 = arith.constant 0 : index
    %3 = vector.load %arg2[%c0_3, %c0_4] : memref<8x256xf32, #tpu.memory_space<vmem>>, vector<8x256xf32>
    %c256 = arith.constant 256 : index
    %c0_5 = arith.constant 0 : index
    %4 = vector.load %arg3[%c256, %c0_5] : memref<512x2xf32, #tpu.memory_space<vmem>>, vector<256x2xf32>
    %cst_6 = arith.constant dense<0.000000e+00> : vector<8x2xf32>
    %5 = tpu.matmul %3, %4, %cst_6 {dimension_numbers = #tpu.dot_dimension_numbers<[1], [0], [0], [1], [0, 0, 1, 1], [], []>} : vector<8x256xf32>, vector<256x2xf32>, vector<8x2xf32> -> vector<8x2xf32>
    %6 = arith.addf %2, %5 : vector<8x2xf32>
    %c0_7 = arith.constant 0 : index
    %c0_8 = arith.constant 0 : index
    %7 = vector.load %arg4[%c0_7, %c0_8] : memref<1x2xf32, #tpu.memory_space<vmem>>, vector<1x2xf32>
    %8 = vector.broadcast %7 : vector<1x2xf32> to vector<8x2xf32>
    %9 = arith.addf %6, %8 : vector<8x2xf32>
    %c0_9 = arith.constant 0 : index
    %c0_10 = arith.constant 0 : index
    %10 = vector.load %arg5[%c0_9, %c0_10] : memref<8x2xf32, #tpu.memory_space<vmem>>, vector<8x2xf32>
    tpu.vector_store %arg5[%c0_9, %c0_10], %9 {strides = array<i32>} : memref<8x2xf32, #tpu.memory_space<vmem>>, vector<8x2xf32>,
    return
  }
  func.func @transform_0(%arg0: i32) -> (i32, i32) {
    %c0_i32 = arith.constant 0 : i32
    %c0_i32_0 = arith.constant 0 : i32
    return %arg0, %c0_i32 : i32, i32
  }
  func.func @transform_1(%arg0: i32) -> (i32, i32) {
    %c0_i32 = arith.constant 0 : i32
    %c0_i32_0 = arith.constant 0 : i32
    return %arg0, %c0_i32 : i32, i32
  }
  func.func @transform_2(%arg0: i32) -> (i32, i32) {
    %c0_i32 = arith.constant 0 : i32
    %c0_i32_0 = arith.constant 0 : i32
    %c0_i32_1 = arith.constant 0 : i32
    return %c0_i32, %c0_i32_0 : i32, i32
  }
  func.func @transform_3(%arg0: i32) -> (i32, i32) {
    %c0_i32 = arith.constant 0 : i32
    %c0_i32_0 = arith.constant 0 : i32
    %c0_i32_1 = arith.constant 0 : i32
    return %c0_i32, %c0_i32_0 : i32, i32
  }
  func.func @transform_4(%arg0: i32) -> (i32, i32) {
    %c0_i32 = arith.constant 0 : i32
    %c0_i32_0 = arith.constant 0 : i32
    return %arg0, %c0_i32 : i32, i32
  }
}

</mosaic_0001>

<bundles_post_ra>
// kernel: tpu_custom_call.1
= control target key start
LH: loop header
LB: loop body
LE: loop exit
PB: predicated region body
PF: predicated region fallthrough
CT: control target
= control target key end

     0   :  { %vm170_vm0 = vcmask 15360   ;;  %s412_s2 = inlined_call_operand.vmem [shape: f32[512,2], index: 2, kind: input, shape index: {}]   ;;  %s413_s0 = inlined_call_operand.vmem [shape: f32[8,256], index: 0, kind: input, shape index: {}]   ;;  %s414_s1 = inlined_call_operand.vmem [shape: f32[8,256], index: 1, kind: input, shape index: {}]   ;;  %s415_s3 = inlined_call_operand.vmem [shape: f32[1,2], index: 3, kind: input, shape index: {}]   ;;  %s416_s4 = inlined_call_operand.vmem [shape: f32[8,2], index: 4, kind: output, shape index: {}]  }
   0x1   :  { %v34_v0 = vld [vmem:[%s412_s2 + $0x78] sm:$0xff]  ;;  %v33_v1 = vld [vmem:[%s412_s2 + $0x70] sm:$0xff]  ;;  %v32_v5 = vld [vmem:[%s412_s2 + $0x68] sm:$0xff] }
   0x2   :  { %v50_v2 = vld [vmem:[%s412_s2 + $0xf8] sm:$0xff]  ;;  %125 = vmatpush.msra.mxu2 %v34_v0  ;;  %v49_v6 = vld [vmem:[%s412_s2 + $0xf0] sm:$0xff]  ;;  %v48_v9 = vld [vmem:[%s412_s2 + $0xe8] sm:$0xff] }
   0x3   :  { %145 = vmatpush.msra.mxu3 %v50_v2  ;;  %v68_v3 = vld [vmem:[%s412_s2 + $0x178] sm:$0xff]  ;;  %v67_v7 = vld [vmem:[%s412_s2 + $0x170] sm:$0xff]  ;;  %v66_v10 = vld [vmem:[%s412_s2 + $0x168] sm:$0xff] }
   0x4   :  { %v84_v4 = vld [vmem:[%s412_s2 + $0x1f8] sm:$0xff]  ;;  %85 = vmatpush.msra.mxu0 %v68_v3  ;;  %v83_v8 = vld [vmem:[%s412_s2 + $0x1f0] sm:$0xff]  ;;  %126 = vmatpush.msra.mxu2 %v33_v1  ;;  %v31_v11 = vld [vmem:[%s412_s2 + $0x60] sm:$0xff] }
   0x5   :  { %105 = vmatpush.msra.mxu1 %v84_v4  ;;  %146 = vmatpush.msra.mxu3 %v49_v6  ;;  %v82_v12 = vld [vmem:[%s412_s2 + $0x1e8] sm:$0xff]  ;;  %v47_v13 = vld [vmem:[%s412_s2 + $0xe0] sm:$0xff]  ;;  %v30_v16 = vld [vmem:[%s412_s2 + $0x58] sm:$0xff] }
   0x6   :  { %86 = vmatpush.msra.mxu0 %v67_v7  ;;  %127 = vmatpush.msra.mxu2 %v32_v5  ;;  %v65_v14 = vld [vmem:[%s412_s2 + $0x160] sm:$0xff]  ;;  %v46_v17 = vld [vmem:[%s412_s2 + $0xd8] sm:$0xff]  ;;  %v29_v20 = vld [vmem:[%s412_s2 + $0x50] sm:$0xff] }
   0x7   :  { %106 = vmatpush.msra.mxu1 %v83_v8  ;;  %147 = vmatpush.msra.mxu3 %v48_v9  ;;  %v81_v15 = vld [vmem:[%s412_s2 + $0x1e0] sm:$0xff]  ;;  %v64_v18 = vld [vmem:[%s412_s2 + $0x158] sm:$0xff]  ;;  %v45_v21 = vld [vmem:[%s412_s2 + $0xd0] sm:$0xff] }
   0x8   :  { %87 = vmatpush.msra.mxu0 %v66_v10  ;;  %128 = vmatpush.msra.mxu2 %v31_v11  ;;  %v80_v19 = vld [vmem:[%s412_s2 + $0x1d8] sm:$0xff]  ;;  %v63_v22 = vld [vmem:[%s412_s2 + $0x150] sm:$0xff]  ;;  %v28_v24 = vld [vmem:[%s412_s2 + $0x48] sm:$0xff] }
   0x9   :  { %107 = vmatpush.msra.mxu1 %v82_v12  ;;  %148 = vmatpush.msra.mxu3 %v47_v13  ;;  %v79_v23 = vld [vmem:[%s412_s2 + $0x1d0] sm:$0xff]  ;;  %v44_v25 = vld [vmem:[%s412_s2 + $0xc8] sm:$0xff]  ;;  %v27_v28 = vld [vmem:[%s412_s2 + $0x40] sm:$0xff] }
   0xa   :  { %88 = vmatpush.msra.mxu0 %v65_v14  ;;  %129 = vmatpush.msra.mxu2 %v30_v16  ;;  %v62_v26 = vld [vmem:[%s412_s2 + $0x148] sm:$0xff]  ;;  %v43_v29 = vld [vmem:[%s412_s2 + $0xc0] sm:$0xff]  ;;  %v26_v32 = vld [vmem:[%s412_s2 + $0x38] sm:$0xff] }
   0xb   :  { %108 = vmatpush.msra.mxu1 %v81_v15  ;;  %149 = vmatpush.msra.mxu3 %v46_v17  ;;  %v78_v27 = vld [vmem:[%s412_s2 + $0x1c8] sm:$0xff]  ;;  %v61_v30 = vld [vmem:[%s412_s2 + $0x140] sm:$0xff]  ;;  %v42_v33 = vld [vmem:[%s412_s2 + $0xb8] sm:$0xff] }
   0xc   :  { %89 = vmatpush.msra.mxu0 %v64_v18  ;;  %130 = vmatpush.msra.mxu2 %v29_v20  ;;  %v77_v31 = vld [vmem:[%s412_s2 + $0x1c0] sm:$0xff]  ;;  %v60_v34 = vld [vmem:[%s412_s2 + $0x138] sm:$0xff]  ;;  %v25_v36 = vld [vmem:[%s412_s2 + $0x30] sm:$0xff] }
   0xd   :  { %109 = vmatpush.msra.mxu1 %v80_v19  ;;  %150 = vmatpush.msra.mxu3 %v45_v21  ;;  %v76_v35 = vld [vmem:[%s412_s2 + $0x1b8] sm:$0xff]  ;;  %v41_v37 = vld [vmem:[%s412_s2 + $0xb0] sm:$0xff]  ;;  %v24_v40 = vld [vmem:[%s412_s2 + $0x28] sm:$0xff] }
   0xe   :  { %90 = vmatpush.msra.mxu0 %v63_v22  ;;  %131 = vmatpush.msra.mxu2 %v28_v24  ;;  %v59_v38 = vld [vmem:[%s412_s2 + $0x130] sm:$0xff]  ;;  %v40_v41 = vld [vmem:[%s412_s2 + $0xa8] sm:$0xff]  ;;  %v23_v44 = vld [vmem:[%s412_s2 + $0x20] sm:$0xff] }
   0xf   :  { %110 = vmatpush.msra.mxu1 %v79_v23  ;;  %151 = vmatpush.msra.mxu3 %v44_v25  ;;  %v75_v39 = vld [vmem:[%s412_s2 + $0x1b0] sm:$0xff]  ;;  %v58_v42 = vld [vmem:[%s412_s2 + $0x128] sm:$0xff]  ;;  %v39_v45 = vld [vmem:[%s412_s2 + $0xa0] sm:$0xff] }
  0x10   :  { %91 = vmatpush.msra.mxu0 %v62_v26  ;;  %132 = vmatpush.msra.mxu2 %v27_v28  ;;  %v74_v43 = vld [vmem:[%s412_s2 + $0x1a8] sm:$0xff]  ;;  %v57_v46 = vld [vmem:[%s412_s2 + $0x120] sm:$0xff]  ;;  %v22_v48 = vld [vmem:[%s412_s2 + $0x18] sm:$0xff] }
  0x11   :  { %111 = vmatpush.msra.mxu1 %v78_v27  ;;  %152 = vmatpush.msra.mxu3 %v43_v29  ;;  %v73_v47 = vld [vmem:[%s412_s2 + $0x1a0] sm:$0xff]  ;;  %v38_v49 = vld [vmem:[%s412_s2 + $0x98] sm:$0xff]  ;;  %v21_v52 = vld [vmem:[%s412_s2 + $0x10] sm:$0xff] }
  0x12   :  { %92 = vmatpush.msra.mxu0 %v61_v30  ;;  %133 = vmatpush.msra.mxu2 %v26_v32  ;;  %v56_v50 = vld [vmem:[%s412_s2 + $0x118] sm:$0xff]  ;;  %v37_v53 = vld [vmem:[%s412_s2 + $0x90] sm:$0xff]  ;;  %v20_v56 = vld [vmem:[%s412_s2 + $0x8] sm:$0xff] }
  0x13   :  { %112 = vmatpush.msra.mxu1 %v77_v31  ;;  %153 = vmatpush.msra.mxu3 %v42_v33  ;;  %v72_v51 = vld [vmem:[%s412_s2 + $0x198] sm:$0xff]  ;;  %v55_v54 = vld [vmem:[%s412_s2 + $0x110] sm:$0xff]  ;;  %v36_v57 = vld [vmem:[%s412_s2 + $0x88] sm:$0xff] }
  0x14   :  { %93 = vmatpush.msra.mxu0 %v60_v34  ;;  %134 = vmatpush.msra.mxu2 %v25_v36  ;;  %v71_v55 = vld [vmem:[%s412_s2 + $0x190] sm:$0xff]  ;;  %v54_v58 = vld [vmem:[%s412_s2 + $0x108] sm:$0xff]  ;;  %v19_v60 = vld [vmem:[%s412_s2] sm:$0xff] }
  0x15   :  { %113 = vmatpush.msra.mxu1 %v76_v35  ;;  %154 = vmatpush.msra.mxu3 %v41_v37  ;;  %v70_v59 = vld [vmem:[%s412_s2 + $0x188] sm:$0xff]  ;;  %v35_v61 = vld [vmem:[%s412_s2 + $0x80] sm:$0xff] }
  0x16   :  { %94 = vmatpush.msra.mxu0 %v59_v38  ;;  %135 = vmatpush.msra.mxu2 %v24_v40  ;;  %v17_v62 = vld [vmem:[%s413_s0] sm:$0xff]  ;;  %v18_v63 = vld [vmem:[%s413_s0 + $0x8] sm:$0xff] }
  0x17   :  { %114 = vmatpush.msra.mxu1 %v75_v39  ;;  %155 = vmatpush.msra.mxu3 %v40_v41  ;;  %v53_v0 = vld [vmem:[%s412_s2 + $0x100] sm:$0xff]  ;;  %v52_v3 = vld [vmem:[%s414_s1 + $0x8] sm:$0xff] }
  0x18   :  { %95 = vmatpush.msra.mxu0 %v58_v42  ;;  %136 = vmatpush.msra.mxu2 %v23_v44  ;;  %v69_v1 = vld [vmem:[%s412_s2 + $0x180] sm:$0xff] }
  0x19   :  { %115 = vmatpush.msra.mxu1 %v74_v43  ;;  %156 = vmatpush.msra.mxu3 %v39_v45  ;;  %v51_v2 = vld [vmem:[%s414_s1] sm:$0xff] }
  0x1a   :  { %96 = vmatpush.msra.mxu0 %v57_v46  ;;  %137 = vmatpush.msra.mxu2 %v22_v48  ;;  %v176_v10 = vld [vmem:[%s415_s3] ss:$0 sm:$0xff] }
  0x1b   :  { %116 = vmatpush.msra.mxu1 %v73_v47  ;;  %157 = vmatpush.msra.mxu3 %v38_v49 }
  0x1c   :  { %97 = vmatpush.msra.mxu0 %v56_v50  ;;  %138 = vmatpush.msra.mxu2 %v21_v52 }
  0x1d   :  { %117 = vmatpush.msra.mxu1 %v72_v51  ;;  %158 = vmatpush.msra.mxu3 %v37_v53 }
  0x1e   :  { %98 = vmatpush.msra.mxu0 %v55_v54  ;;  %139 = vmatpush.msra.mxu2 %v20_v56 }
  0x1f   :  { %118 = vmatpush.msra.mxu1 %v71_v55  ;;  %159 = vmatpush.msra.mxu3 %v36_v57 }
  0x20   :  { %99 = vmatpush.msra.mxu0 %v54_v58  ;;  %140 = vmatpush.msra.mxu2 %v19_v60 }
  0x21   :  { %119 = vmatpush.msra.mxu1 %v70_v59  ;;  %160 = vmatpush.msra.mxu3 %v35_v61 }
  0x22   :  { %141 = vmatmul.f32.vlgmr.msra.gmra.mxu2 %v17_v62  ;;  %161 = vmatmul.f32.vlgmr.msra.gmra.mxu3 %v18_v63 }
  0x23   :  { %100 = vmatpush.msra.mxu0 %v53_v0  ;;  %120 = vmatpush.msra.mxu1 %v69_v1 }
  0x24   :  { %101 = vmatmul.f32.vlgmr.msra.gmra.mxu0 %v51_v2  ;;  %121 = vmatmul.f32.vlgmr.msra.gmra.mxu1 %v52_v3 }
  0xa1   :  { %v102_v4 = vpop.f32.mrf.mxu0  ;;  %v122_v5 = vpop.f32.mrf.mxu1 }
  0xa2   :  { %v123_v6 = vadd.f32 %v122_v5, %v102_v4 }
  0xa5   :  { %v142_v7 = vpop.f32.mrf.mxu2  ;;  %v162_v8 = vpop.f32.mrf.mxu3 }
  0xa6   :  { %v143_v9 = vadd.f32 %v142_v7, %v123_v6 }
  0xa8   :  { %v163_v11 = vadd.f32 %v162_v8, %v143_v9 }
  0xaa   :  { %v169_v12 = vadd.f32 %v176_v10, %v163_v11 }
  0xac   :  { %171 = vst.msk [vmem:[%s416_s4] sm:$0xff] %vm170_vm0, %v169_v12 }

</bundles_post_ra>
